<compile_context>
chip_gen: v6e
topology: v6e:2x2x1
jax: 0.10.0
libtpu: 0.0.40
codegen_flags: <defaults>
</compile_context>

<pallas_src>
import jax
import jax.numpy as jnp
from jax.experimental import pallas as pl
from jax.experimental.pallas import tpu as pltpu


# ---------------------------------------------------------------------------
# In-kernel math helpers
# ---------------------------------------------------------------------------
def _erf(x):
    # Abramowitz & Stegun 7.1.26 rational approximation (|err| < 1.5e-7 with an
    # exact divide; the EUP approx reciprocal adds ~1e-4 relative error in t,
    # still well inside fp32 tolerance for GELU). exp/mul/add only.
    ax = jnp.abs(x)
    t = pl.reciprocal(1.0 + 0.3275911 * ax, approx=True)   # EUP, free slot
    poly = ((((1.061405429 * t - 1.453152027) * t + 1.421413741) * t
             - 0.284496736) * t + 0.254829592) * t
    y = 1.0 - poly * jnp.exp(-ax * ax)
    return jnp.where(x >= 0, y, -y)


def _gelu_exact(x):
    return 0.5 * x * (1.0 + _erf(x * 0.7071067811865475))


# ---------------------------------------------------------------------------
# Fused FeedForward kernel: (BLOCK_M, dim) rows per grid step, both matmuls
# and the GEGLU gating done entirely in VMEM.
# ---------------------------------------------------------------------------
def _geglu_ff_kernel(x_ref, w1_ref, b1_ref, w2_ref, b2_ref, o_ref):
    x = x_ref[...]                                              # (BLOCK_M, dim)
    h = jnp.dot(x, w1_ref[...],
                preferred_element_type=jnp.float32) + b1_ref[...]   # (BLOCK_M, 2*hidden)
    half = w2_ref.shape[0]          # dim * mult — lane-aligned (multiple of 128)
    val = h[:, :half]
    gates = h[:, half:]
    y = jnp.dot(val * _gelu_exact(gates), w2_ref[...],
                preferred_element_type=jnp.float32) + b2_ref[...]   # (BLOCK_M, dim)
    o_ref[...] = y.astype(o_ref.dtype)
    # TODO(synk): nn.Dropout(p=0.0) is an identity at p=0 / eval — intentionally omitted.


def feedforward(x, w1, b1, w2, b2, *, block_m=8):
    """x: (..., dim) -> (..., dim). Fused Linear -> GEGLU -> Linear.

    block_m: rows per grid step (multiple of 8).  For large batches pick a
    bigger block (128–512) while keeping >= 2 grid steps for v7x megacore.
    """
    dim = x.shape[-1]
    assert w1.shape == (dim, 2 * w2.shape[0]) and w2.shape[1] == dim

    x2 = x.reshape(-1, dim).astype(jnp.float32)
    m = x2.shape[0]
    if m >= 8:
        block_m = max(8, min(block_m, m))
        pad = (-m) % block_m
        if pad:
            x2 = jnp.pad(x2, ((0, pad), (0, 0)))
    else:
        block_m, pad = m, 0                      # tiny input: single full block
    mp = x2.shape[0]
    grid = (mp // block_m,)

    out = pl.pallas_call(
        _geglu_ff_kernel,
        grid=grid,
        in_specs=[
            pl.BlockSpec((block_m, dim), lambda i: (i, 0)),   # activations: tiled rows
            pl.BlockSpec(w1.shape, lambda i: (0, 0)),         # weights resident in VMEM
            pl.BlockSpec(b1.shape, lambda i: (0, 0)),
            pl.BlockSpec(w2.shape, lambda i: (0, 0)),
            pl.BlockSpec(b2.shape, lambda i: (0, 0)),
        ],
        out_specs=pl.BlockSpec((block_m, dim), lambda i: (i, 0)),
        out_shape=jax.ShapeDtypeStruct((mp, dim), jnp.float32),
        compiler_params=pltpu.CompilerParams(
            dimension_semantics=("parallel",)),               # shard rows over v7x's 2 TCs
    )(x2, w1, b1, w2, b2)

    if pad:
        out = out[:m]
    return out.reshape(x.shape[:-1] + (dim,))


# ---------------------------------------------------------------------------
# Pure-JAX reference (exact-erf GELU) for a correctness spot-check
# ---------------------------------------------------------------------------
def _reference(x, w1, b1, w2, b2):
    h = x @ w1 + b1
    half = w2.shape[0]
    val, gates = h[..., :half], h[..., half:]
    return (val * jax.nn.gelu(gates, approximate=False)) @ w2 + b2


if __name__ == "__main__":
    B, T, DIM, MULT = 2, 8, 128, 4
    HIDDEN = DIM * MULT

    key = jax.random.PRNGKey(0)
    kx, k1, k2, k3, k4 = jax.random.split(key, 5)
    x = jax.random.normal(kx, (B, T, DIM), jnp.float32)
    w1 = (0.02 * jax.random.normal(k1, (DIM, 2 * HIDDEN))).astype(jnp.float32)
    b1 = (0.02 * jax.random.normal(k2, (1, 2 * HIDDEN))).astype(jnp.float32)
    w2 = (0.02 * jax.random.normal(k3, (HIDDEN, DIM))).astype(jnp.float32)
    b2 = (0.02 * jax.random.normal(k4, (1, DIM))).astype(jnp.float32)

    out = feedforward(x, w1, b1, w2, b2)
    out = jax.block_until_ready(out)
    assert out.shape == (B, T, DIM), out.shape
    assert bool(jnp.all(jnp.isfinite(out)))

    ref = _reference(x, w1, b1, w2, b2)
    max_err = float(jnp.max(jnp.abs(out - ref)))
    assert max_err < 1e-2, f"max abs err vs reference: {max_err}"

    print("KERNEL_OK")
</pallas_src>

<mosaic_0001>
module attributes {stable_mosaic.version = 11 : i64} {
  func.func @_geglu_ff_kernel(%arg0: i32, %arg1: memref<8x128xf32, #tpu.memory_space<vmem>>, %arg2: memref<128x1024xf32, #tpu.memory_space<vmem>>, %arg3: memref<1x1024xf32, #tpu.memory_space<vmem>>, %arg4: memref<512x128xf32, #tpu.memory_space<vmem>>, %arg5: memref<1x128xf32, #tpu.memory_space<vmem>>, %arg6: memref<8x128xf32, #tpu.memory_space<vmem>>) attributes {dimension_semantics = [#tpu.dimension_semantics<parallel>], iteration_bounds = array<i64: 2>, scalar_prefetch = 0 : i64, scratch_operands = 0 : i64, tpu.core_type = #tpu.core_type<tc>, window_params = [{transform_indices = @transform_0, window_bounds = array<i64: 8, 128>}, {pipeline_mode = #tpu.pipeline_mode<synchronous>, transform_indices = @transform_1, window_bounds = array<i64: 128, 1024>}, {pipeline_mode = #tpu.pipeline_mode<synchronous>, transform_indices = @transform_2, window_bounds = array<i64: 1, 1024>}, {pipeline_mode = #tpu.pipeline_mode<synchronous>, transform_indices = @transform_3, window_bounds = array<i64: 512, 128>}, {pipeline_mode = #tpu.pipeline_mode<synchronous>, transform_indices = @transform_4, window_bounds = array<i64: 1, 128>}, {transform_indices = @transform_5, window_bounds = array<i64: 8, 128>}]} {
    %c0 = arith.constant 0 : index
    %c0_0 = arith.constant 0 : index
    %0 = vector.load %arg1[%c0, %c0_0] : memref<8x128xf32, #tpu.memory_space<vmem>>, vector<8x128xf32>
    %c0_1 = arith.constant 0 : index
    %c0_2 = arith.constant 0 : index
    %1 = vector.load %arg2[%c0_1, %c0_2] : memref<128x1024xf32, #tpu.memory_space<vmem>>, vector<128x1024xf32>
    %cst = arith.constant dense<0.000000e+00> : vector<8x1024xf32>
    %2 = tpu.matmul %0, %1, %cst {dimension_numbers = #tpu.dot_dimension_numbers<[1], [0], [0], [1], [0, 0, 1, 1], [], []>} : vector<8x128xf32>, vector<128x1024xf32>, vector<8x1024xf32> -> vector<8x1024xf32>
    %c0_3 = arith.constant 0 : index
    %c0_4 = arith.constant 0 : index
    %3 = vector.load %arg3[%c0_3, %c0_4] : memref<1x1024xf32, #tpu.memory_space<vmem>>, vector<1x1024xf32>
    %4 = vector.broadcast %3 : vector<1x1024xf32> to vector<8x1024xf32>
    %5 = arith.addf %2, %4 : vector<8x1024xf32>
    %6 = vector.extract_strided_slice %5 {offsets = [0, 0], sizes = [8, 512], strides = [1, 1]} : vector<8x1024xf32> to vector<8x512xf32>
    %7 = vector.extract_strided_slice %5 {offsets = [0, 512], sizes = [8, 512], strides = [1, 1]} : vector<8x1024xf32> to vector<8x512xf32>
    %cst_5 = arith.constant 5.000000e-01 : f32
    %8 = vector.broadcast %cst_5 : f32 to vector<8x512xf32>
    %9 = arith.mulf %8, %7 : vector<8x512xf32>
    %cst_6 = arith.constant 0.707106769 : f32
    %10 = vector.broadcast %cst_6 : f32 to vector<8x512xf32>
    %11 = arith.mulf %7, %10 : vector<8x512xf32>
    %12 = math.absf %11 : vector<8x512xf32>
    %cst_7 = arith.constant 0.327591091 : f32
    %13 = vector.broadcast %cst_7 : f32 to vector<8x512xf32>
    %14 = arith.mulf %13, %12 : vector<8x512xf32>
    %cst_8 = arith.constant 1.000000e+00 : f32
    %15 = vector.broadcast %cst_8 : f32 to vector<8x512xf32>
    %16 = arith.addf %15, %14 : vector<8x512xf32>
    %17 = tpu.reciprocal %16 {approx = true} : vector<8x512xf32> -> vector<8x512xf32>
    %cst_9 = arith.constant 1.06140542 : f32
    %18 = vector.broadcast %cst_9 : f32 to vector<8x512xf32>
    %19 = arith.mulf %18, %17 : vector<8x512xf32>
    %cst_10 = arith.constant 1.45315206 : f32
    %20 = vector.broadcast %cst_10 : f32 to vector<8x512xf32>
    %21 = arith.subf %19, %20 : vector<8x512xf32>
    %22 = arith.mulf %21, %17 : vector<8x512xf32>
    %cst_11 = arith.constant 1.42141378 : f32
    %23 = vector.broadcast %cst_11 : f32 to vector<8x512xf32>
    %24 = arith.addf %22, %23 : vector<8x512xf32>
    %25 = arith.mulf %24, %17 : vector<8x512xf32>
    %cst_12 = arith.constant 0.284496725 : f32
    %26 = vector.broadcast %cst_12 : f32 to vector<8x512xf32>
    %27 = arith.subf %25, %26 : vector<8x512xf32>
    %28 = arith.mulf %27, %17 : vector<8x512xf32>
    %cst_13 = arith.constant 0.254829586 : f32
    %29 = vector.broadcast %cst_13 : f32 to vector<8x512xf32>
    %30 = arith.addf %28, %29 : vector<8x512xf32>
    %31 = arith.mulf %30, %17 : vector<8x512xf32>
    %cst_14 = arith.constant 0.000000e+00 : f32
    %32 = vector.broadcast %cst_14 : f32 to vector<8x512xf32>
    %33 = arith.subf %32, %12 : vector<8x512xf32>
    %34 = arith.mulf %33, %12 : vector<8x512xf32>
    %35 = math.exp %34 : vector<8x512xf32>
    %36 = arith.mulf %31, %35 : vector<8x512xf32>
    %cst_15 = arith.constant 1.000000e+00 : f32
    %37 = vector.broadcast %cst_15 : f32 to vector<8x512xf32>
    %38 = arith.subf %37, %36 : vector<8x512xf32>
    %cst_16 = arith.constant 0.000000e+00 : f32
    %39 = vector.broadcast %cst_16 : f32 to vector<8x512xf32>
    %40 = arith.cmpf oge, %11, %39 : vector<8x512xf32>
    %cst_17 = arith.constant 0.000000e+00 : f32
    %41 = vector.broadcast %cst_17 : f32 to vector<8x512xf32>
    %42 = arith.subf %41, %38 : vector<8x512xf32>
    %43 = arith.select %40, %38, %42 : vector<8x512xi1>, vector<8x512xf32>
    %cst_18 = arith.constant 1.000000e+00 : f32
    %44 = vector.broadcast %cst_18 : f32 to vector<8x512xf32>
    %45 = arith.addf %44, %43 : vector<8x512xf32>
    %46 = arith.mulf %9, %45 : vector<8x512xf32>
    %47 = arith.mulf %6, %46 : vector<8x512xf32>
    %c0_19 = arith.constant 0 : index
    %c0_20 = arith.constant 0 : index
    %48 = vector.load %arg4[%c0_19, %c0_20] : memref<512x128xf32, #tpu.memory_space<vmem>>, vector<512x128xf32>
    %cst_21 = arith.constant dense<0.000000e+00> : vector<8x128xf32>
    %49 = tpu.matmul %47, %48, %cst_21 {dimension_numbers = #tpu.dot_dimension_numbers<[1], [0], [0], [1], [0, 0, 1, 1], [], []>} : vector<8x512xf32>, vector<512x128xf32>, vector<8x128xf32> -> vector<8x128xf32>
    %c0_22 = arith.constant 0 : index
    %c0_23 = arith.constant 0 : index
    %50 = vector.load %arg5[%c0_22, %c0_23] : memref<1x128xf32, #tpu.memory_space<vmem>>, vector<1x128xf32>
    %51 = vector.broadcast %50 : vector<1x128xf32> to vector<8x128xf32>
    %52 = arith.addf %49, %51 : vector<8x128xf32>
    %c0_24 = arith.constant 0 : index
    %c0_25 = arith.constant 0 : index
    %53 = vector.load %arg6[%c0_24, %c0_25] : memref<8x128xf32, #tpu.memory_space<vmem>>, vector<8x128xf32>
    tpu.vector_store %arg6[%c0_24, %c0_25], %52 {strides = array<i32>} : memref<8x128xf32, #tpu.memory_space<vmem>>, vector<8x128xf32>,
    return
  }
  func.func @transform_0(%arg0: i32) -> (i32, i32) {
    %c0_i32 = arith.constant 0 : i32
    %c0_i32_0 = arith.constant 0 : i32
    return %arg0, %c0_i32 : i32, i32
  }
  func.func @transform_1(%arg0: i32) -> (i32, i32) {
    %c0_i32 = arith.constant 0 : i32
    %c0_i32_0 = arith.constant 0 : i32
    %c0_i32_1 = arith.constant 0 : i32
    return %c0_i32, %c0_i32_0 : i32, i32
  }
  func.func @transform_2(%arg0: i32) -> (i32, i32) {
    %c0_i32 = arith.constant 0 : i32
    %c0_i32_0 = arith.constant 0 : i32
    %c0_i32_1 = arith.constant 0 : i32
    return %c0_i32, %c0_i32_0 : i32, i32
  }
  func.func @transform_3(%arg0: i32) -> (i32, i32) {
    %c0_i32 = arith.constant 0 : i32
    %c0_i32_0 = arith.constant 0 : i32
    %c0_i32_1 = arith.constant 0 : i32
    return %c0_i32, %c0_i32_0 : i32, i32
  }
  func.func @transform_4(%arg0: i32) -> (i32, i32) {
    %c0_i32 = arith.constant 0 : i32
    %c0_i32_0 = arith.constant 0 : i32
    %c0_i32_1 = arith.constant 0 : i32
    return %c0_i32, %c0_i32_0 : i32, i32
  }
  func.func @transform_5(%arg0: i32) -> (i32, i32) {
    %c0_i32 = arith.constant 0 : i32
    %c0_i32_0 = arith.constant 0 : i32
    return %arg0, %c0_i32 : i32, i32
  }
}

</mosaic_0001>

<bundles_post_ra>
// kernel: tpu_custom_call.1
= control target key start
LH: loop header
LB: loop body
LE: loop exit
PB: predicated region body
PF: predicated region fallthrough
CT: control target
= control target key end

     0   :  { %10 = vsyncpa [#allocation3], 0  ;;  %s1846_s0 = inlined_call_operand.hbm [shape: f32[16,128], index: 0, kind: input, shape index: {}]   ;;  %s1847_s1 = inlined_call_operand.hbm [shape: f32[128,1024], index: 1, kind: input, shape index: {}]   ;;  %s1848_s2 = inlined_call_operand.hbm [shape: f32[1,1024], index: 2, kind: input, shape index: {}]   ;;  %s1849_s3 = inlined_call_operand.hbm [shape: f32[512,128], index: 3, kind: input, shape index: {}]   ;;  %s1850_s4 = inlined_call_operand.vmem [shape: f32[1,128], index: 4, kind: input, shape index: {}]   ;;  %s1851_s5 = inlined_call_operand.hbm [shape: f32[16,128], index: 5, kind: output, shape index: {}]  }
   0x1   :  { %12 = vsyncpa [#allocation3 + $0x1], 0 }
   0x2   :  { %13 = vsyncpa [#allocation6], 0 }
   0x3   :  { %14 = vsyncpa [#allocation9], 0 }
   0x4   :  { %15 = vsyncpa [#allocation4], 0 }
   0x5   :  { %17 = vsyncpa [#allocation4 + $0x1], 0  ;;  %s1585_s18 = smov 0   ;;  %s1587_s19 = smov 0  }
   0x6   :  { %s1589_s20 = smov 0   ;;  %s1591_s21 = smov 0  }
   0x7 LB: > { %s1606_s22 = sadd.s32 4294967295, %s1543_s21   ;;  %s1170_s23 = sadd.s32 4294967294, %s1543_s21   ;;  %s1543_s21 = sphi %s1591_s21, %s1875_s21   ;;  %s1539_s20 = sphi %s1589_s20, %s1874_s20   ;;  %s1535_s19 = sphi %s1587_s19, %s1873_s19   ;;  %s1531_s18 = sphi %s1585_s18, %s1872_s18  }
   0x8   : > { %p43_p0 = scmp.ne.s32.totalorder %s1535_s19, %s1531_s18  ;;  %p1852_p1 = scmp.eq.s32.totalorder %s1606_s22, 0 }
   0x9   : > { %p157_p3 = scmp.eq.s32.totalorder %s1170_s23, 1  ;;  %p1171_p5 = scmp.ge.s32.totalorder %s1543_s21, 1 }
   0xa   : > { %p1615_p4 = por %p1852_p1, %p43_p0  ;;  %p164_p7 = scmp.lt.s32.totalorder %s1543_s21, 3 }
   0xb   : > { %p1620_p6 = por %p157_p3, %p43_p0  ;;  %s1545_s27 = smov [#allocation5]  }
   0xc   : > { %s1856_s24 = scalar_select %p1615_p4, 1, 0 }
   0xd   : > { %s1857_s25 = scalar_select %p1620_p6, 1, 0 }
   0xe   : > { %p1625_p8 = pnand %p1171_p5, %p164_p7  ;;  %s176_s28 = sshll.u32 %s1545_s27, 4  ;;  %s177_s28 = int_to_ptr.vmem [resolvable:$true] %s176_s28 }
   0xf   : > { %s1546_s30 = smov [#allocation7]   ;;  %s1547_s7 = smov [#allocation8]  }
  0x10   : > { %s1858_s26 = scalar_select %p1625_p8, 1, 0 }
  0x11   : > { %p1283_p9 = pneg %p1625_p8  ;;  %s190_s6 = sshll.u32 %s1546_s30, 4  ;;  %s191_s6 = int_to_ptr.vmem [resolvable:$true] %s190_s6 }
  0x12   : > { %s200_s8 = sshll.u32 %s1547_s7, 4  ;;  %s1376_s9 = scalar_lea.vmem %s177_s28, 16384  ;;  %s201_s8 = int_to_ptr.vmem [resolvable:$true] %s200_s8 }
  0x13   : > { %p1634_p11 = pnand %p1283_p9, %p1852_p1  ;;  %p1377_p13 = scmp.ne.s32.totalorder %s177_s28, %s1376_s9 }
  0x14   : > { %p1384_p5 = scmp.lt.s32.totalorder %s177_s28, %s177_s28  ;;  %p1385_p7 = scmp.lt.s32.totalorder %s1376_s9, %s1376_s9 }
  0x15   : > { %p1367_p12 = pneg %p1634_p11 }
  0x16   : > { %p1386_p9 = por %p1385_p7, %p1384_p5 }
  0x17   : > { %p1379_p0 = pnand %p1377_p13, %p1367_p12 }
  0x19   : > { %p1380_p3 = pneg %p1379_p0 }
  0x1b   : > { %p1387_p10 = pnand %p1386_p9, %p1380_p3 }
  0x1d   : > { %1390 = shalt.err (!%p1387_p10)
}
  0x1e   : > { %s1548_s10 = smov 1024   ;;  %s1549_s11 = smov 64  }
  0x1f   : > { %1286 = dma.hbm_to_vmem [thread:$0]  (!%p1634_p11), %s1847_s1, 16384, %s177_s28, [#allocation6], %s1548_s10, %s1548_s10, %s1549_s11  }
  0x20   : > { %s1402_s14 = scalar_lea.vmem %s191_s6, 128  ;;  %p1410_p2 = scmp.lt.s32.totalorder %s191_s6, %s191_s6 }
  0x21   : > { %p1403_p1 = scmp.ne.s32.totalorder %s191_s6, %s1402_s14  ;;  %p1411_p6 = scmp.lt.s32.totalorder %s1402_s14, %s1402_s14 }
  0x23   : > { %p1405_p13 = pnand %p1403_p1, %p1367_p12  ;;  %p1412_p5 = por %p1411_p6, %p1410_p2 }
  0x25   : > { %p1406_p0 = pneg %p1405_p13 }
  0x27   : > { %p1413_p3 = pnand %p1412_p5, %p1406_p0 }
  0x29   : > { %1416 = shalt.err (!%p1413_p3)
}
  0x2a   : > { %1289 = dma.hbm_to_vmem [thread:$0]  (!%p1634_p11), %s1848_s2, 128, %s191_s6, [#allocation6]  }
  0x2b   : > { %s1428_s17 = scalar_lea.vmem %s201_s8, 8192  ;;  %p1436_p9 = scmp.lt.s32.totalorder %s201_s8, %s201_s8 }
  0x2c   : > { %p1429_p10 = scmp.ne.s32.totalorder %s201_s8, %s1428_s17  ;;  %p1437_p13 = scmp.lt.s32.totalorder %s1428_s17, %s1428_s17 }
  0x2e   : > { %p1431_p7 = pnand %p1429_p10, %p1367_p12  ;;  %p1438_p4 = por %p1437_p13, %p1436_p9 }
  0x30   : > { %p1432_p1 = pneg %p1431_p7 }
  0x32   : > { %p1439_p2 = pnand %p1438_p4, %p1432_p1 }
  0x34   : > { %1442 = shalt.err (!%p1439_p2)
}
  0x35   : > { %s1550_s23 = smov 128   ;;  %s1551_s27 = smov 8  }
  0x36   : > { %1292 = dma.hbm_to_vmem [thread:$0]  (!%p1634_p11), %s1849_s3, 8192, %s201_s8, [#allocation9], %s1550_s23, %s1550_s23, %s1551_s27  }
  0x37   : > { %s1665_s6 = sadd.s32 1, %s1543_s21   ;;  %s30_s9 = sadd.s32 1, %s1539_s20 }
  0x38   : > { %s27_s7 = ssub.s32 %s1543_s21, %s1665_s6  ;;  %p37_p6 = scmp.ne.s32.totalorder %s1539_s20, %s1535_s19 }
  0x39   : > { %p28_p4 = scmp.eq.s32.totalorder %s27_s7, 0  ;;  %p38_p12 = scmp.eq.s32.totalorder %s1543_s21, 0 }
  0x3a   : > { %p1304_p0 = scmp.lt.s32.totalorder %s1543_s21, 2  ;;  %p1860_p3 = scmp.eq.s32.totalorder %s1606_s22, 1 }
  0x3b   : > { %s1675_s10 = scalar_select %p28_p4, %s1539_s20, %s30_s9  }
  0x3c   : > { %p39_p5 = por %p38_p12, %p37_p6  ;;  %p1679_p10 = por %p1860_p3, %p37_p6 }
  0x3d   : > { %s217_s29 = sand.u32 1, %s1539_s20   ;;  %s1177_s12 = sshll.u32 %s1543_s21, 7 }
  0x3e   : > { %s1861_s11 = scalar_select %p1679_p10, 1, 0 }
  0x3f   : > { %s1176_s8 = sshll.u32 %s217_s29, 3  ;;  %s1688_s15 = scalar_lea.hbm %s1846_s0, %s1177_s12 }
  0x40   : > { %s221_s16 = scalar_lea.vmem [#allocation2], %s1176_s8  ;;  %p1690_p11 = pnand %p1304_p0, %p39_p5 }
  0x41   : > { %s228_s17 = sshll.u32 %s221_s16, 4  ;;  %s218_s27 = scalar_lea.sflag [#allocation3], %s217_s29  ;;  %s229_s17 = int_to_ptr.vmem [resolvable:$true] %s228_s17 }
  0x42   : > { %s1443_s28 = scalar_lea.hbm %s1688_s15, 128  ;;  %p1445_p1 = pneg %p1690_p11 }
  0x43   : > { %p1444_p7 = scmp.ne.s32.totalorder %s1688_s15, %s1443_s28  ;;  %s1448_s9 = scalar_lea.hbm %s1846_s0, 256 }
  0x44   : > { %p1449_p2 = scmp.lt.s32.totalorder %s1688_s15, %s1846_s0  ;;  %p1450_p4 = scmp.lt.s32.totalorder %s1448_s9, %s1443_s28 }
  0x45   : > { %p1446_p9 = pnand %p1445_p1, %p1444_p7 }
  0x46   : > { %p1451_p6 = por %p1450_p4, %p1449_p2 }
  0x47   : > { %p1447_p13 = pneg %p1446_p9 }
  0x49   : > { %p1452_p12 = pnand %p1451_p6, %p1447_p13 }
  0x4b   : > { %1455 = shalt.err (!%p1452_p12)
}
  0x4c   : > { %s1456_s13 = scalar_lea.vmem %s229_s17, 128  ;;  %s1552_s29 = smov [#allocation2]  }
  0x4d   : > { %p1457_p0 = scmp.ne.s32.totalorder %s229_s17, %s1456_s13  ;;  %s1461_s14 = sshll.u32 %s1552_s29, 4  ;;  %s1462_s14 = int_to_ptr.vmem [resolvable:$false] %s1461_s14 }
  0x4e   : > { %s1463_s16 = scalar_lea.vmem %s1462_s14, 256  ;;  %p1464_p7 = scmp.lt.s32.totalorder %s229_s17, %s1462_s14 }
  0x4f   : > { %p1459_p5 = pnand %p1457_p0, %p1445_p1  ;;  %p1465_p9 = scmp.lt.s32.totalorder %s1463_s16, %s1456_s13 }
  0x51   : > { %p1460_p3 = pneg %p1459_p5  ;;  %p1466_p10 = por %p1465_p9, %p1464_p7 }
  0x53   : > { %p1467_p8 = pnand %p1466_p10, %p1460_p3 }
  0x55   : > { %1470 = shalt.err (!%p1467_p8)
}
  0x56   : > { %1296 = dma.hbm_to_vmem [thread:$0]  (!%p1690_p11), %s1688_s15, 128, %s229_s17, %s218_s27  }
  0x57   : > { %p1863_p13 = scmp.ne.s32.totalorder %s1858_s26, 0 }
  0x58   : > { %s1711_s28 = sand.u32 (!%p1863_p13), 1, %s1535_s19   ;;  %p1864_p8 = scmp.ne.s32.totalorder (!%p1863_p13), %s1856_s24, 0 }
  0x59   : > { %237 = sbr.rel (%p1863_p13) target bundleno = 634 (0x27a), region = 40  ;;  %s1179_s30 = sshll.u32 (!%p1863_p13), %s1711_s28, 3 }
  0x5a   : > { %s240_s7 = scalar_lea.sflag (!%p1863_p13), [#allocation3], %s1711_s28  ;;  %s1717_s9 = scalar_lea.vmem (!%p1863_p13), [#allocation2], %s1179_s30 }
  0x5e   : > { %1514 = dma.done.wait (%p1864_p8), %s240_s7, 128  }
  0x5f   : > { %1516 = vsyncadd (%p1864_p8), %s240_s7, 4294967168  ;;  %p1865_p10 = scmp.eq.s32.totalorder %s1606_s22, 0 }
  0x61   : > { %1518 = dma.done.wait (%p1865_p10), [#allocation6], 16512   ;;  %p1866_p11 = pmov %p1865_p10 }
  0x62   : > { %p1867_p1 = pmov %p1865_p10 }
  0x63   : > { %1520 = vsyncadd (%p1866_p11), [#allocation6], 4294950784 }
  0x64   : > { %1522 = dma.done.wait (%p1867_p1), [#allocation9], 8192   ;;  %p1868_p2 = pmov %p1867_p1 }
  0x65   : > { %v1553_v0 = vmov 0.0   ;;  %v404_v1 = vld [vmem:[#allocation5 + $0x3c8] sm:$0xff]  ;;  %v406_v2 = vld [vmem:[#allocation5 + $0x3d8] sm:$0xff]  ;;  %v403_v3 = vld [vmem:[#allocation5 + $0x3c0] sm:$0xff]  ;;  %s1194_s15 = sshll.u32 %s1606_s22, 7  ;;  %s281_s17 = scalar_lea.vmem [#allocation10], %s1179_s30 }
  0x66   : > { %1524 = vsyncadd (%p1868_p2), [#allocation9], 4294959104  ;;  %517 = vmatprep.mubr.f32.mxu0 %v1553_v0  ;;  %588 = vmatprep.mubr.f32.mxu1 %v1553_v0  ;;  %v405_v4 = vld [vmem:[#allocation5 + $0x3d0] sm:$0xff]  ;;  %v396_v5 = vld [vmem:[#allocation5 + $0x388] sm:$0xff]  ;;  %s1071_s23 = sshll.u32 %s281_s17, 4  ;;  %s1069_s8 = scalar_lea.hbm %s1851_s5, %s1194_s15  ;;  %s1072_s23 = int_to_ptr.vmem [resolvable:$true] %s1071_s23 }
  0x67   : > { %453 = vmatprep.subr.mxu0 %v404_v1  ;;  %524 = vmatprep.subr.mxu1 %v406_v2  ;;  %v398_v6 = vld [vmem:[#allocation5 + $0x398] sm:$0xff]  ;;  %v395_v7 = vld [vmem:[#allocation5 + $0x380] sm:$0xff]  ;;  %v397_v8 = vld [vmem:[#allocation5 + $0x390] sm:$0xff]  ;;  %s1058_s13 = scalar_lea.sflag [#allocation4], %s1711_s28  ;;  %s1471_s29 = scalar_lea.vmem %s1072_s23, 128 }
  0x68   : > { %454 = vmatpush1.msra.mxu0 %v403_v3  ;;  %525 = vmatpush1.msra.mxu1 %v405_v4  ;;  %v388_v9 = vld [vmem:[#allocation5 + $0x348] sm:$0xff]  ;;  %v390_v10 = vld [vmem:[#allocation5 + $0x358] sm:$0xff]  ;;  %v387_v11 = vld [vmem:[#allocation5 + $0x340] sm:$0xff]  ;;  %p1472_p4 = scmp.ne.s32.totalorder %s1072_s23, %s1471_s29  ;;  %p1869_p6 = scmp.ne.s32.totalorder %s1861_s11, 0 }
  0x69   : > { %455 = vmatprep.subr.mxu0 %v396_v5  ;;  %526 = vmatprep.subr.mxu1 %v398_v6  ;;  %v389_v12 = vld [vmem:[#allocation5 + $0x350] sm:$0xff]  ;;  %v380_v13 = vld [vmem:[#allocation5 + $0x308] sm:$0xff]  ;;  %v382_v14 = vld [vmem:[#allocation5 + $0x318] sm:$0xff]  ;;  %s1554_s14 = smov [#allocation10]  }
  0x6a   : > { %456 = vmatpush1.msra.mxu0 %v395_v7  ;;  %527 = vmatpush1.msra.mxu1 %v397_v8  ;;  %v379_v15 = vld [vmem:[#allocation5 + $0x300] sm:$0xff]  ;;  %v381_v16 = vld [vmem:[#allocation5 + $0x310] sm:$0xff]  ;;  %v372_v17 = vld [vmem:[#allocation5 + $0x2c8] sm:$0xff]  ;;  %p1473_p12 = pnand %p1472_p4, %p1869_p6  ;;  %s1475_s22 = sshll.u32 %s1554_s14, 4  ;;  %s1476_s22 = int_to_ptr.vmem [resolvable:$false] %s1475_s22 }
  0x6b   : > { %457 = vmatprep.subr.mxu0 %v388_v9  ;;  %528 = vmatprep.subr.mxu1 %v390_v10  ;;  %v374_v18 = vld [vmem:[#allocation5 + $0x2d8] sm:$0xff]  ;;  %v371_v19 = vld [vmem:[#allocation5 + $0x2c0] sm:$0xff]  ;;  %v373_v20 = vld [vmem:[#allocation5 + $0x2d0] sm:$0xff]  ;;  %s1477_s16 = scalar_lea.vmem %s1476_s22, 256  ;;  %p1478_p5 = scmp.lt.s32.totalorder %s1072_s23, %s1476_s22 }
  0x6c   : > { %458 = vmatpush1.msra.mxu0 %v387_v11  ;;  %529 = vmatpush1.msra.mxu1 %v389_v12  ;;  %v364_v21 = vld [vmem:[#allocation5 + $0x288] sm:$0xff]  ;;  %v366_v22 = vld [vmem:[#allocation5 + $0x298] sm:$0xff]  ;;  %v363_v23 = vld [vmem:[#allocation5 + $0x280] sm:$0xff]  ;;  %p1474_p0 = pneg %p1473_p12  ;;  %p1479_p3 = scmp.lt.s32.totalorder %s1477_s16, %s1471_s29 }
  0x6d   : > { %459 = vmatprep.subr.mxu0 %v380_v13  ;;  %530 = vmatprep.subr.mxu1 %v382_v14  ;;  %v365_v24 = vld [vmem:[#allocation5 + $0x290] sm:$0xff]  ;;  %v356_v25 = vld [vmem:[#allocation5 + $0x248] sm:$0xff]  ;;  %v358_v26 = vld [vmem:[#allocation5 + $0x258] sm:$0xff] }
  0x6e   : > { %460 = vmatpush1.msra.mxu0 %v379_v15  ;;  %531 = vmatpush1.msra.mxu1 %v381_v16  ;;  %v355_v27 = vld [vmem:[#allocation5 + $0x240] sm:$0xff]  ;;  %v357_v28 = vld [vmem:[#allocation5 + $0x250] sm:$0xff]  ;;  %v348_v29 = vld [vmem:[#allocation5 + $0x208] sm:$0xff]  ;;  %p1480_p7 = por %p1479_p3, %p1478_p5 }
  0x6f   : > { %461 = vmatprep.subr.mxu0 %v372_v17  ;;  %532 = vmatprep.subr.mxu1 %v374_v18  ;;  %v350_v30 = vld [vmem:[#allocation5 + $0x218] sm:$0xff]  ;;  %v347_v31 = vld [vmem:[#allocation5 + $0x200] sm:$0xff]  ;;  %v349_v32 = vld [vmem:[#allocation5 + $0x210] sm:$0xff] }
  0x70   : > { %462 = vmatpush1.msra.mxu0 %v371_v19  ;;  %533 = vmatpush1.msra.mxu1 %v373_v20  ;;  %v340_v33 = vld [vmem:[#allocation5 + $0x1c8] sm:$0xff]  ;;  %v342_v34 = vld [vmem:[#allocation5 + $0x1d8] sm:$0xff]  ;;  %v339_v35 = vld [vmem:[#allocation5 + $0x1c0] sm:$0xff]  ;;  %p1481_p9 = pnand %p1480_p7, %p1474_p0 }
  0x71   : > { %463 = vmatprep.subr.mxu0 %v364_v21  ;;  %534 = vmatprep.subr.mxu1 %v366_v22  ;;  %v341_v36 = vld [vmem:[#allocation5 + $0x1d0] sm:$0xff]  ;;  %v332_v37 = vld [vmem:[#allocation5 + $0x188] sm:$0xff]  ;;  %v334_v38 = vld [vmem:[#allocation5 + $0x198] sm:$0xff] }
  0x72   : > { %464 = vmatpush1.msra.mxu0 %v363_v23  ;;  %535 = vmatpush1.msra.mxu1 %v365_v24  ;;  %v331_v39 = vld [vmem:[#allocation5 + $0x180] sm:$0xff]  ;;  %v333_v40 = vld [vmem:[#allocation5 + $0x190] sm:$0xff]  ;;  %v324_v41 = vld [vmem:[#allocation5 + $0x148] sm:$0xff] }
  0x73   : > { %465 = vmatprep.subr.mxu0 %v356_v25  ;;  %536 = vmatprep.subr.mxu1 %v358_v26  ;;  %v326_v42 = vld [vmem:[#allocation5 + $0x158] sm:$0xff]  ;;  %v323_v43 = vld [vmem:[#allocation5 + $0x140] sm:$0xff]  ;;  %v325_v44 = vld [vmem:[#allocation5 + $0x150] sm:$0xff] }
  0x74   : > { %466 = vmatpush1.msra.mxu0 %v355_v27  ;;  %537 = vmatpush1.msra.mxu1 %v357_v28  ;;  %v316_v45 = vld [vmem:[#allocation5 + $0x108] sm:$0xff]  ;;  %v318_v46 = vld [vmem:[#allocation5 + $0x118] sm:$0xff]  ;;  %v315_v47 = vld [vmem:[#allocation5 + $0x100] sm:$0xff] }
  0x75   : > { %467 = vmatprep.subr.mxu0 %v348_v29  ;;  %538 = vmatprep.subr.mxu1 %v350_v30  ;;  %v317_v48 = vld [vmem:[#allocation5 + $0x110] sm:$0xff]  ;;  %v308_v49 = vld [vmem:[#allocation5 + $0xc8] sm:$0xff]  ;;  %v310_v50 = vld [vmem:[#allocation5 + $0xd8] sm:$0xff] }
  0x76   : > { %468 = vmatpush1.msra.mxu0 %v347_v31  ;;  %539 = vmatpush1.msra.mxu1 %v349_v32  ;;  %v307_v51 = vld [vmem:[#allocation5 + $0xc0] sm:$0xff]  ;;  %v309_v52 = vld [vmem:[#allocation5 + $0xd0] sm:$0xff]  ;;  %v300_v53 = vld [vmem:[#allocation5 + $0x88] sm:$0xff] }
  0x77   : > { %469 = vmatprep.subr.mxu0 %v340_v33  ;;  %540 = vmatprep.subr.mxu1 %v342_v34  ;;  %v302_v54 = vld [vmem:[#allocation5 + $0x98] sm:$0xff]  ;;  %v299_v55 = vld [vmem:[#allocation5 + $0x80] sm:$0xff]  ;;  %v301_v56 = vld [vmem:[#allocation5 + $0x90] sm:$0xff] }
  0x78   : > { %470 = vmatpush1.msra.mxu0 %v339_v35  ;;  %541 = vmatpush1.msra.mxu1 %v341_v36  ;;  %v292_v57 = vld [vmem:[#allocation5 + $0x48] sm:$0xff]  ;;  %v294_v58 = vld [vmem:[#allocation5 + $0x58] sm:$0xff]  ;;  %v291_v59 = vld [vmem:[#allocation5 + $0x40] sm:$0xff] }
  0x79   : > { %471 = vmatprep.subr.mxu0 %v332_v37  ;;  %542 = vmatprep.subr.mxu1 %v334_v38  ;;  %v293_v60 = vld [vmem:[#allocation5 + $0x50] sm:$0xff]  ;;  %v284_v61 = vld [vmem:[#allocation5 + $0x8] sm:$0xff]  ;;  %v286_v62 = vld [vmem:[#allocation5 + $0x18] sm:$0xff] }
  0x7a   : > { %472 = vmatpush1.msra.mxu0 %v331_v39  ;;  %543 = vmatpush1.msra.mxu1 %v333_v40  ;;  %v283_v63 = vld [vmem:[#allocation5] sm:$0xff]  ;;  %v285_v1 = vld [vmem:[#allocation5 + $0x10] sm:$0xff]  ;;  %v408_v3 = vld [vmem:[#allocation5 + $0x3e8] sm:$0xff] }
  0x7b   : > { %473 = vmatprep.subr.mxu0 %v324_v41  ;;  %544 = vmatprep.subr.mxu1 %v326_v42  ;;  %v1734_v2 = vld [vmem:[%s1717_s9] sm:$0xff]  ;;  %v407_v5 = vld [vmem:[#allocation5 + $0x3e0] sm:$0xff]  ;;  %v400_v7 = vld [vmem:[#allocation5 + $0x3a8] sm:$0xff] }
  0x7c   : > { %474 = vmatpush1.msra.mxu0 %v323_v43  ;;  %545 = vmatpush1.msra.mxu1 %v325_v44  ;;  %v410_v4 = vld [vmem:[#allocation5 + $0x3f8] sm:$0xff]  ;;  %v409_v6 = vld [vmem:[#allocation5 + $0x3f0] sm:$0xff]  ;;  %v399_v9 = vld [vmem:[#allocation5 + $0x3a0] sm:$0xff] }
  0x7d   : > { %475 = vmatprep.subr.mxu0 %v316_v45  ;;  %546 = vmatprep.subr.mxu1 %v318_v46  ;;  %v402_v8 = vld [vmem:[#allocation5 + $0x3b8] sm:$0xff]  ;;  %v401_v10 = vld [vmem:[#allocation5 + $0x3b0] sm:$0xff]  ;;  %v392_v11 = vld [vmem:[#allocation5 + $0x368] sm:$0xff] }
  0x7e   : > { %476 = vmatpush1.msra.mxu0 %v315_v47  ;;  %547 = vmatpush1.msra.mxu1 %v317_v48  ;;  %v394_v12 = vld [vmem:[#allocation5 + $0x378] sm:$0xff]  ;;  %v391_v13 = vld [vmem:[#allocation5 + $0x360] sm:$0xff]  ;;  %v393_v14 = vld [vmem:[#allocation5 + $0x370] sm:$0xff] }
  0x7f   : > { %477 = vmatprep.subr.mxu0 %v308_v49  ;;  %548 = vmatprep.subr.mxu1 %v310_v50  ;;  %v384_v15 = vld [vmem:[#allocation5 + $0x328] sm:$0xff]  ;;  %v386_v16 = vld [vmem:[#allocation5 + $0x338] sm:$0xff]  ;;  %v383_v17 = vld [vmem:[#allocation5 + $0x320] sm:$0xff] }
  0x80   : > { %478 = vmatpush1.msra.mxu0 %v307_v51  ;;  %549 = vmatpush1.msra.mxu1 %v309_v52  ;;  %v385_v18 = vld [vmem:[#allocation5 + $0x330] sm:$0xff]  ;;  %v376_v19 = vld [vmem:[#allocation5 + $0x2e8] sm:$0xff]  ;;  %v378_v20 = vld [vmem:[#allocation5 + $0x2f8] sm:$0xff] }
  0x81   : > { %479 = vmatprep.subr.mxu0 %v300_v53  ;;  %550 = vmatprep.subr.mxu1 %v302_v54  ;;  %v375_v21 = vld [vmem:[#allocation5 + $0x2e0] sm:$0xff]  ;;  %v377_v22 = vld [vmem:[#allocation5 + $0x2f0] sm:$0xff]  ;;  %v368_v23 = vld [vmem:[#allocation5 + $0x2a8] sm:$0xff] }
  0x82   : > { %480 = vmatpush1.msra.mxu0 %v299_v55  ;;  %551 = vmatpush1.msra.mxu1 %v301_v56  ;;  %v370_v24 = vld [vmem:[#allocation5 + $0x2b8] sm:$0xff]  ;;  %v367_v25 = vld [vmem:[#allocation5 + $0x2a0] sm:$0xff]  ;;  %v369_v26 = vld [vmem:[#allocation5 + $0x2b0] sm:$0xff] }
  0x83   : > { %481 = vmatprep.subr.mxu0 %v292_v57  ;;  %552 = vmatprep.subr.mxu1 %v294_v58  ;;  %v360_v27 = vld [vmem:[#allocation5 + $0x268] sm:$0xff]  ;;  %v362_v28 = vld [vmem:[#allocation5 + $0x278] sm:$0xff]  ;;  %v359_v29 = vld [vmem:[#allocation5 + $0x260] sm:$0xff] }
  0x84   : > { %482 = vmatpush1.msra.mxu0 %v291_v59  ;;  %553 = vmatpush1.msra.mxu1 %v293_v60  ;;  %v361_v30 = vld [vmem:[#allocation5 + $0x270] sm:$0xff]  ;;  %v352_v31 = vld [vmem:[#allocation5 + $0x228] sm:$0xff]  ;;  %v354_v32 = vld [vmem:[#allocation5 + $0x238] sm:$0xff] }
  0x85   : > { %483 = vmatprep.subr.mxu0 %v284_v61  ;;  %554 = vmatprep.subr.mxu1 %v286_v62  ;;  %v351_v33 = vld [vmem:[#allocation5 + $0x220] sm:$0xff]  ;;  %v353_v34 = vld [vmem:[#allocation5 + $0x230] sm:$0xff]  ;;  %v344_v35 = vld [vmem:[#allocation5 + $0x1e8] sm:$0xff] }
  0x86   : > { %484 = vmatpush1.msra.mxu0 %v283_v63  ;;  %555 = vmatpush1.msra.mxu1 %v285_v1  ;;  %v346_v36 = vld [vmem:[#allocation5 + $0x1f8] sm:$0xff]  ;;  %v343_v37 = vld [vmem:[#allocation5 + $0x1e0] sm:$0xff]  ;;  %v345_v38 = vld [vmem:[#allocation5 + $0x1f0] sm:$0xff] }
  0x87   : > { %518 = vmatmul.mubr.f32.vlgmr.msra.gmra.mxu0 %v1734_v2  ;;  %595 = vmatprep.subr.mxu0 %v408_v3  ;;  %v336_v39 = vld [vmem:[#allocation5 + $0x1a8] sm:$0xff]  ;;  %v338_v40 = vld [vmem:[#allocation5 + $0x1b8] sm:$0xff]  ;;  %v335_v41 = vld [vmem:[#allocation5 + $0x1a0] sm:$0xff] }
  0x88   : > { %666 = vmatprep.subr.mxu1 %v410_v4  ;;  %589 = vmatmul.mubr.f32.vlgmr.msra.gmra.mxu1 %v1734_v2  ;;  %v337_v42 = vld [vmem:[#allocation5 + $0x1b0] sm:$0xff]  ;;  %v328_v43 = vld [vmem:[#allocation5 + $0x168] sm:$0xff]  ;;  %v330_v44 = vld [vmem:[#allocation5 + $0x178] sm:$0xff] }
  0x89   : > { %596 = vmatpush1.msra.mxu0 %v407_v5  ;;  %667 = vmatpush1.msra.mxu1 %v409_v6  ;;  %v327_v45 = vld [vmem:[#allocation5 + $0x160] sm:$0xff]  ;;  %v329_v46 = vld [vmem:[#allocation5 + $0x170] sm:$0xff]  ;;  %v320_v47 = vld [vmem:[#allocation5 + $0x128] sm:$0xff] }
  0x8a   : > { %597 = vmatprep.subr.mxu0 %v400_v7  ;;  %668 = vmatprep.subr.mxu1 %v402_v8  ;;  %v322_v48 = vld [vmem:[#allocation5 + $0x138] sm:$0xff]  ;;  %v319_v49 = vld [vmem:[#allocation5 + $0x120] sm:$0xff]  ;;  %v321_v50 = vld [vmem:[#allocation5 + $0x130] sm:$0xff] }
  0x8b   : > { %598 = vmatpush1.msra.mxu0 %v399_v9  ;;  %669 = vmatpush1.msra.mxu1 %v401_v10  ;;  %v312_v51 = vld [vmem:[#allocation5 + $0xe8] sm:$0xff]  ;;  %v314_v52 = vld [vmem:[#allocation5 + $0xf8] sm:$0xff]  ;;  %v311_v53 = vld [vmem:[#allocation5 + $0xe0] sm:$0xff] }
  0x8c   : > { %599 = vmatprep.subr.mxu0 %v392_v11  ;;  %670 = vmatprep.subr.mxu1 %v394_v12  ;;  %v313_v54 = vld [vmem:[#allocation5 + $0xf0] sm:$0xff]  ;;  %v304_v55 = vld [vmem:[#allocation5 + $0xa8] sm:$0xff]  ;;  %v306_v56 = vld [vmem:[#allocation5 + $0xb8] sm:$0xff] }
  0x8d   : > { %600 = vmatpush1.msra.mxu0 %v391_v13  ;;  %671 = vmatpush1.msra.mxu1 %v393_v14  ;;  %v303_v57 = vld [vmem:[#allocation5 + $0xa0] sm:$0xff]  ;;  %v305_v58 = vld [vmem:[#allocation5 + $0xb0] sm:$0xff]  ;;  %v296_v59 = vld [vmem:[#allocation5 + $0x68] sm:$0xff] }
  0x8e   : > { %601 = vmatprep.subr.mxu0 %v384_v15  ;;  %672 = vmatprep.subr.mxu1 %v386_v16  ;;  %v298_v60 = vld [vmem:[#allocation5 + $0x78] sm:$0xff]  ;;  %v295_v61 = vld [vmem:[#allocation5 + $0x60] sm:$0xff]  ;;  %v297_v62 = vld [vmem:[#allocation5 + $0x70] sm:$0xff] }
  0x8f   : > { %602 = vmatpush1.msra.mxu0 %v383_v17  ;;  %673 = vmatpush1.msra.mxu1 %v385_v18  ;;  %v288_v63 = vld [vmem:[#allocation5 + $0x28] sm:$0xff]  ;;  %v290_v1 = vld [vmem:[#allocation5 + $0x38] sm:$0xff]  ;;  %v287_v3 = vld [vmem:[#allocation5 + $0x20] sm:$0xff] }
  0x90   : > { %603 = vmatprep.subr.mxu0 %v376_v19  ;;  %674 = vmatprep.subr.mxu1 %v378_v20  ;;  %v289_v4 = vld [vmem:[#allocation5 + $0x30] sm:$0xff]  ;;  %v876_v5 = vld [vmem:[#allocation8 + $0xf8] sm:$0xff]  ;;  %v875_v9 = vld [vmem:[#allocation8 + $0xf0] sm:$0xff] }
  0x91   : > { %604 = vmatpush1.msra.mxu0 %v375_v21  ;;  %675 = vmatpush1.msra.mxu1 %v377_v22  ;;  %v908_v6 = vld [vmem:[#allocation8 + $0x1f8] sm:$0xff]  ;;  %v907_v10 = vld [vmem:[#allocation8 + $0x1f0] sm:$0xff]  ;;  %v906_v13 = vld [vmem:[#allocation8 + $0x1e8] sm:$0xff] }
  0x92   : > { %605 = vmatprep.subr.mxu0 %v368_v23  ;;  %676 = vmatprep.subr.mxu1 %v370_v24  ;;  %v860_v7 = vld [vmem:[#allocation8 + $0x78] sm:$0xff]  ;;  %v859_v11 = vld [vmem:[#allocation8 + $0x70] sm:$0xff]  ;;  %v890_v14 = vld [vmem:[#allocation8 + $0x168] sm:$0xff] }
  0x93   : > { %606 = vmatpush1.msra.mxu0 %v367_v25  ;;  %677 = vmatpush1.msra.mxu1 %v369_v26  ;;  %v892_v8 = vld [vmem:[#allocation8 + $0x178] sm:$0xff]  ;;  %v891_v12 = vld [vmem:[#allocation8 + $0x170] sm:$0xff]  ;;  %v873_v15 = vld [vmem:[#allocation8 + $0xe0] sm:$0xff] }
  0x94   : > { %607 = vmatprep.subr.mxu0 %v360_v27  ;;  %678 = vmatprep.subr.mxu1 %v362_v28  ;;  %v905_v16 = vld [vmem:[#allocation8 + $0x1e0] sm:$0xff]  ;;  %v872_v19 = vld [vmem:[#allocation8 + $0xd8] sm:$0xff]  ;;  %v871_v23 = vld [vmem:[#allocation8 + $0xd0] sm:$0xff] }
  0x95   : > { %608 = vmatpush1.msra.mxu0 %v359_v29  ;;  %679 = vmatpush1.msra.mxu1 %v361_v30  ;;  %v857_v17 = vld [vmem:[#allocation8 + $0x60] sm:$0xff]  ;;  %v904_v20 = vld [vmem:[#allocation8 + $0x1d8] sm:$0xff]  ;;  %v903_v24 = vld [vmem:[#allocation8 + $0x1d0] sm:$0xff] }
  0x96   : > { %609 = vmatprep.subr.mxu0 %v352_v31  ;;  %680 = vmatprep.subr.mxu1 %v354_v32  ;;  %v889_v18 = vld [vmem:[#allocation8 + $0x160] sm:$0xff]  ;;  %v856_v21 = vld [vmem:[#allocation8 + $0x58] sm:$0xff]  ;;  %v855_v25 = vld [vmem:[#allocation8 + $0x50] sm:$0xff] }
  0x97   : > { %610 = vmatpush1.msra.mxu0 %v351_v33  ;;  %681 = vmatpush1.msra.mxu1 %v353_v34  ;;  %v888_v22 = vld [vmem:[#allocation8 + $0x158] sm:$0xff]  ;;  %v887_v26 = vld [vmem:[#allocation8 + $0x150] sm:$0xff]  ;;  %v870_v27 = vld [vmem:[#allocation8 + $0xc8] sm:$0xff] }
  0x98   : > { %611 = vmatprep.subr.mxu0 %v344_v35  ;;  %682 = vmatprep.subr.mxu1 %v346_v36  ;;  %v902_v28 = vld [vmem:[#allocation8 + $0x1c8] sm:$0xff]  ;;  %v869_v31 = vld [vmem:[#allocation8 + $0xc0] sm:$0xff]  ;;  %v868_v35 = vld [vmem:[#allocation8 + $0xb8] sm:$0xff] }
  0x99   : > { %612 = vmatpush1.msra.mxu0 %v343_v37  ;;  %683 = vmatpush1.msra.mxu1 %v345_v38  ;;  %v854_v29 = vld [vmem:[#allocation8 + $0x48] sm:$0xff]  ;;  %v901_v32 = vld [vmem:[#allocation8 + $0x1c0] sm:$0xff]  ;;  %v900_v36 = vld [vmem:[#allocation8 + $0x1b8] sm:$0xff] }
  0x9a   : > { %613 = vmatprep.subr.mxu0 %v336_v39  ;;  %684 = vmatprep.subr.mxu1 %v338_v40  ;;  %v886_v30 = vld [vmem:[#allocation8 + $0x148] sm:$0xff]  ;;  %v853_v33 = vld [vmem:[#allocation8 + $0x40] sm:$0xff]  ;;  %v852_v37 = vld [vmem:[#allocation8 + $0x38] sm:$0xff] }
  0x9b   : > { %614 = vmatpush1.msra.mxu0 %v335_v41  ;;  %685 = vmatpush1.msra.mxu1 %v337_v42  ;;  %v885_v34 = vld [vmem:[#allocation8 + $0x140] sm:$0xff]  ;;  %v884_v38 = vld [vmem:[#allocation8 + $0x138] sm:$0xff]  ;;  %v867_v39 = vld [vmem:[#allocation8 + $0xb0] sm:$0xff] }
  0x9c   : > { %615 = vmatprep.subr.mxu0 %v328_v43  ;;  %686 = vmatprep.subr.mxu1 %v330_v44  ;;  %v899_v40 = vld [vmem:[#allocation8 + $0x1b0] sm:$0xff]  ;;  %v866_v43 = vld [vmem:[#allocation8 + $0xa8] sm:$0xff] }
  0x9d   : > { %616 = vmatpush1.msra.mxu0 %v327_v45  ;;  %687 = vmatpush1.msra.mxu1 %v329_v46  ;;  %v851_v41 = vld [vmem:[#allocation8 + $0x30] sm:$0xff]  ;;  %v898_v44 = vld [vmem:[#allocation8 + $0x1a8] sm:$0xff] }
  0x9e   : > { %617 = vmatprep.subr.mxu0 %v320_v47  ;;  %688 = vmatprep.subr.mxu1 %v322_v48  ;;  %v883_v42 = vld [vmem:[#allocation8 + $0x130] sm:$0xff]  ;;  %v850_v45 = vld [vmem:[#allocation8 + $0x28] sm:$0xff]  ;;  %v865_v47 = vld [vmem:[#allocation8 + $0xa0] sm:$0xff] }
  0x9f   : > { %618 = vmatpush1.msra.mxu0 %v319_v49  ;;  %689 = vmatpush1.msra.mxu1 %v321_v50  ;;  %v882_v46 = vld [vmem:[#allocation8 + $0x128] sm:$0xff]  ;;  %v897_v48 = vld [vmem:[#allocation8 + $0x1a0] sm:$0xff] }
  0xa0   : > { %619 = vmatprep.subr.mxu0 %v312_v51  ;;  %690 = vmatprep.subr.mxu1 %v314_v52  ;;  %v849_v49 = vld [vmem:[#allocation8 + $0x20] sm:$0xff]  ;;  %v864_v51 = vld [vmem:[#allocation8 + $0x98] sm:$0xff] }
  0xa1   : > { %620 = vmatpush1.msra.mxu0 %v311_v53  ;;  %691 = vmatpush1.msra.mxu1 %v313_v54  ;;  %v881_v50 = vld [vmem:[#allocation8 + $0x120] sm:$0xff]  ;;  %v896_v52 = vld [vmem:[#allocation8 + $0x198] sm:$0xff] }
  0xa2   : > { %621 = vmatprep.subr.mxu0 %v304_v55  ;;  %692 = vmatprep.subr.mxu1 %v306_v56  ;;  %v848_v53 = vld [vmem:[#allocation8 + $0x18] sm:$0xff]  ;;  %v863_v55 = vld [vmem:[#allocation8 + $0x90] sm:$0xff] }
  0xa3   : > { %622 = vmatpush1.msra.mxu0 %v303_v57  ;;  %693 = vmatpush1.msra.mxu1 %v305_v58  ;;  %v880_v54 = vld [vmem:[#allocation8 + $0x118] sm:$0xff]  ;;  %v895_v56 = vld [vmem:[#allocation8 + $0x190] sm:$0xff] }
  0xa4   : > { %623 = vmatprep.subr.mxu0 %v296_v59  ;;  %694 = vmatprep.subr.mxu1 %v298_v60  ;;  %v847_v57 = vld [vmem:[#allocation8 + $0x10] sm:$0xff]  ;;  %v862_v59 = vld [vmem:[#allocation8 + $0x88] sm:$0xff] }
  0xa5   : > { %624 = vmatpush1.msra.mxu0 %v295_v61  ;;  %695 = vmatpush1.msra.mxu1 %v297_v62  ;;  %v879_v58 = vld [vmem:[#allocation8 + $0x110] sm:$0xff]  ;;  %v894_v60 = vld [vmem:[#allocation8 + $0x188] sm:$0xff] }
  0xa6   : > { %625 = vmatprep.subr.mxu0 %v288_v63  ;;  %696 = vmatprep.subr.mxu1 %v290_v1  ;;  %v846_v61 = vld [vmem:[#allocation8 + $0x8] sm:$0xff]  ;;  %v861_v63 = vld [vmem:[#allocation8 + $0x80] sm:$0xff] }
  0xa7   : > { %626 = vmatpush1.msra.mxu0 %v287_v3  ;;  %659 = vmatprep.mubr.f32.mxu0 %v1553_v0  ;;  %v878_v62 = vld [vmem:[#allocation8 + $0x108] sm:$0xff]  ;;  %v893_v1 = vld [vmem:[#allocation8 + $0x180] sm:$0xff] }
  0xa8   : > { %697 = vmatpush1.msra.mxu1 %v289_v4  ;;  %730 = vmatprep.mubr.f32.mxu1 %v1553_v0  ;;  %v874_v0 = vld [vmem:[#allocation8 + $0xe8] sm:$0xff]  ;;  %v845_v3 = vld [vmem:[#allocation8] sm:$0xff] }
  0xa9   : > { %660 = vmatmul.mubr.f32.vlgmr.msra.gmra.mxu0 %v1734_v2  ;;  %731 = vmatmul.mubr.f32.vlgmr.msra.gmra.mxu1 %v1734_v2  ;;  %v858_v2 = vld [vmem:[#allocation8 + $0x68] sm:$0xff]  ;;  %v877_v4 = vld [vmem:[#allocation8 + $0x100] sm:$0xff] }
  0xaa   : > { %1197 = vmatprep.subr.mxu0 %v876_v5  ;;  %1232 = vmatprep.subr.mxu1 %v908_v6  ;;  %v413_v5 = vlaneseq }
  0xab   : > { %1198 = vmatpush3.msra.mxu0 %v860_v7  ;;  %1233 = vmatpush3.msra.mxu1 %v892_v8 }
  0xac   : > { %1199 = vmatprep.subr.mxu0 %v875_v9  ;;  %1234 = vmatprep.subr.mxu1 %v907_v10  ;;  %v1742_v6 = vshrl.u32 %v413_v5, 7 }
  0xad   : > { %1200 = vmatpush3.msra.mxu0 %v859_v11  ;;  %1235 = vmatpush3.msra.mxu1 %v891_v12  ;;  %v1750_v11 = vld [vmem:[#allocation7] sm:$0xff] }
  0xae   : > { %1201 = vmatprep.subr.mxu0 %v874_v0  ;;  %1236 = vmatprep.subr.mxu1 %v906_v13  ;;  %v431_v7 = vsub.s32 4, %v1742_v6  ;;  %v439_v8 = vsub.s32 6, %v1742_v6  ;;  %v435_v12 = vsub.s32 5, %v1742_v6  ;;  %v443_v0 = vsub.s32 7, %v1742_v6 }
  0xaf   : > { %1202 = vmatpush3.msra.mxu0 %v858_v2  ;;  %1237 = vmatpush3.msra.mxu1 %v890_v14 }
  0xb0   : > { %1203 = vmatprep.subr.mxu0 %v873_v15  ;;  %1238 = vmatprep.subr.mxu1 %v905_v16  ;;  %v432_v13 = vrot.slane %v1750_v11, %v431_v7  ;;  %v440_v2 = vrot.slane %v1750_v11, %v439_v8 }
  0xb1   : > { %1204 = vmatpush3.msra.mxu0 %v857_v17  ;;  %1239 = vmatpush3.msra.mxu1 %v889_v18  ;;  %v436_v18 = vrot.slane %v1750_v11, %v435_v12 }
  0xb2   : > { %1205 = vmatprep.subr.mxu0 %v872_v19  ;;  %1240 = vmatprep.subr.mxu1 %v904_v20  ;;  %v444_v19 = vrot.slane %v1750_v11, %v443_v0 }
  0xb3   : > { %1206 = vmatpush3.msra.mxu0 %v856_v21  ;;  %1241 = vmatpush3.msra.mxu1 %v888_v22 }
  0xb4   : > { %1207 = vmatprep.subr.mxu0 %v871_v23  ;;  %1242 = vmatprep.subr.mxu1 %v903_v24 }
  0xb5   : > { %1208 = vmatpush3.msra.mxu0 %v855_v25  ;;  %1243 = vmatpush3.msra.mxu1 %v887_v26 }
  0xb6   : > { %1209 = vmatprep.subr.mxu0 %v870_v27  ;;  %1244 = vmatprep.subr.mxu1 %v902_v28 }
  0xb7   : > { %1210 = vmatpush3.msra.mxu0 %v854_v29  ;;  %1245 = vmatpush3.msra.mxu1 %v886_v30 }
  0xb8   : > { %1211 = vmatprep.subr.mxu0 %v869_v31  ;;  %1246 = vmatprep.subr.mxu1 %v901_v32 }
  0xb9   : > { %1212 = vmatpush3.msra.mxu0 %v853_v33  ;;  %1247 = vmatpush3.msra.mxu1 %v885_v34 }
  0xba   : > { %1213 = vmatprep.subr.mxu0 %v868_v35  ;;  %1248 = vmatprep.subr.mxu1 %v900_v36 }
  0xbb   : > { %1214 = vmatpush3.msra.mxu0 %v852_v37  ;;  %1249 = vmatpush3.msra.mxu1 %v884_v38 }
  0xbc   : > { %1215 = vmatprep.subr.mxu0 %v867_v39  ;;  %1250 = vmatprep.subr.mxu1 %v899_v40 }
  0xbd   : > { %1216 = vmatpush3.msra.mxu0 %v851_v41  ;;  %1251 = vmatpush3.msra.mxu1 %v883_v42 }
  0xbe   : > { %1217 = vmatprep.subr.mxu0 %v866_v43  ;;  %1252 = vmatprep.subr.mxu1 %v898_v44 }
  0xbf   : > { %1218 = vmatpush3.msra.mxu0 %v850_v45  ;;  %1253 = vmatpush3.msra.mxu1 %v882_v46 }
  0xc0   : > { %1219 = vmatprep.subr.mxu0 %v865_v47  ;;  %1254 = vmatprep.subr.mxu1 %v897_v48 }
  0xc1   : > { %1220 = vmatpush3.msra.mxu0 %v849_v49  ;;  %1255 = vmatpush3.msra.mxu1 %v881_v50 }
  0xc2   : > { %1221 = vmatprep.subr.mxu0 %v864_v51  ;;  %1256 = vmatprep.subr.mxu1 %v896_v52 }
  0xc3   : > { %1222 = vmatpush3.msra.mxu0 %v848_v53  ;;  %1257 = vmatpush3.msra.mxu1 %v880_v54 }
  0xc4   : > { %1223 = vmatprep.subr.mxu0 %v863_v55  ;;  %1258 = vmatprep.subr.mxu1 %v895_v56 }
  0xc5   : > { %1224 = vmatpush3.msra.mxu0 %v847_v57  ;;  %1259 = vmatpush3.msra.mxu1 %v879_v58 }
  0xc6   : > { %1225 = vmatprep.subr.mxu0 %v862_v59  ;;  %1260 = vmatprep.subr.mxu1 %v894_v60 }
  0xc7   : > { %1226 = vmatpush3.msra.mxu0 %v846_v61  ;;  %1261 = vmatpush3.msra.mxu1 %v878_v62 }
  0xc8   : > { %1227 = vmatprep.subr.mxu0 %v861_v63  ;;  %1262 = vmatprep.subr.mxu1 %v893_v1 }
  0xc9   : > { %1228 = vmatpush3.msra.mxu0 %v845_v3  ;;  %1263 = vmatpush3.msra.mxu1 %v877_v4 }
 0x147   : > { %v1746_v9 = vpop.f32.mrf.mxu0 }
 0x148   : > { %v1748_v10 = vpop.f32.mrf.mxu1 }
 0x149   : > { %v1756_v14 = vpop.f32.mrf.mxu0 }
 0x14a   : > { %v1758_v15 = vpop.f32.mrf.mxu1 }
 0x169   : > { %v661_v16 = vpop.f32.mrf.mxu0  ;;  %v732_v17 = vpop.f32.mrf.mxu1 }
 0x16a   : > { %v1762_v20 = vadd.f32 %v661_v16, %v432_v13  ;;  %v1764_v21 = vadd.f32 %v732_v17, %v440_v2 }
 0x16b   : > { %v663_v22 = vpop.f32.mrf.mxu0  ;;  %v734_v23 = vpop.f32.mrf.mxu1 }
 0x16c   : > { %v1767_v24 = vmul.f32 0.70710677, %v1762_v20  ;;  %v1770_v25 = vmul.f32 0.70710677, %v1764_v21  ;;  %v1772_v26 = vadd.f32 %v663_v22, %v436_v18  ;;  %v1774_v27 = vadd.f32 %v734_v23, %v444_v19 }
 0x16e   : > { %v745_v28 = vand.u32 2147483647, %v1767_v24  ;;  %v747_v29 = vand.u32 2147483647, %v1770_v25  ;;  %v1779_v30 = vmul.f32 0.70710677, %v1772_v26 }
 0x16f   : > { %v1782_v31 = vmul.f32 0.70710677, %v1774_v27  ;;  %vm821_vm0 = vcmp.ge.f32.partialorder %v1767_v24, 0.0  ;;  %vm823_vm1 = vcmp.ge.f32.partialorder %v1770_v25, 0.0  ;;  %v737_v24 = vmul.f32 0.5, %v1762_v20 }
 0x170   : > { %v749_v32 = vmul.f32 0.3275911, %v745_v28  ;;  %v751_v33 = vmul.f32 0.3275911, %v747_v29  ;;  %v746_v34 = vand.u32 2147483647, %v1779_v30 }
 0x171   : > { %v748_v35 = vand.u32 2147483647, %v1782_v31  ;;  %v797_v42 = vsub.f32 0.0, %v745_v28  ;;  %v799_v43 = vsub.f32 0.0, %v747_v29  ;;  %vm822_vm2 = vcmp.ge.f32.partialorder %v1779_v30, 0.0 }
 0x172   : > { %v753_v36 = vadd.f32 1.0, %v749_v32  ;;  %v755_v37 = vadd.f32 1.0, %v751_v33  ;;  %v750_v38 = vmul.f32 0.3275911, %v746_v34  ;;  %v798_v45 = vsub.f32 0.0, %v746_v34 }
 0x173   : > { %v752_v39 = vmul.f32 0.3275911, %v748_v35  ;;  %v801_v44 = vmul.f32 %v797_v42, %v745_v28  ;;  %v803_v46 = vmul.f32 %v799_v43, %v747_v29  ;;  %v800_v47 = vsub.f32 0.0, %v748_v35 }
 0x174   : > { %1349 = vrcp.f32 %v753_v36  ;;  %v754_v40 = vadd.f32 1.0, %v750_v38  ;;  %v802_v52 = vmul.f32 %v798_v45, %v746_v34  ;;  %vm824_vm3 = vcmp.ge.f32.partialorder %v1782_v31, 0.0 }
 0x175   : > { %1351 = vrcp.f32 %v755_v37  ;;  %v756_v41 = vadd.f32 1.0, %v752_v39  ;;  %v805_v51 = vmul.f32 1.442695, %v801_v44  ;;  %v809_v54 = vmul.f32 1.442695, %v803_v46 }
 0x176   : > { %1353 = vrcp.f32 %v754_v40  ;;  %v804_v55 = vmul.f32 %v800_v47, %v748_v35  ;;  %v807_v61 = vmul.f32 1.442695, %v802_v52  ;;  %v740_v20 = vmul.f32 0.5, %v1774_v27 }
 0x177   : > { %1355 = vrcp.f32 %v756_v41 }
 0x178   : > { %1357 = vpow2.f32 %v805_v51  ;;  %v811_v1 = vmul.f32 1.442695, %v804_v55 }
 0x179   : > { %1359 = vpow2.f32 %v809_v54 }
 0x17a   : > { %1361 = vpow2.f32 %v807_v61 }
 0x17b   : > { %1363 = vpow2.f32 %v811_v1 }
 0x181   : > { %v1350_v48 = vpop.eup %1349 }
 0x182   : > { %v1352_v49 = vpop.eup %1351  ;;  %v761_v50 = vmul.f32 1.0614054, %v1350_v48 }
 0x183   : > { %v763_v53 = vmul.f32 1.0614054, %v1352_v49  ;;  %v1354_v57 = vpop.eup %1353 }
 0x184   : > { %v1184_v56 = vadd.f32 -1.4531521, %v761_v50  ;;  %v762_v60 = vmul.f32 1.0614054, %v1354_v57  ;;  %v1356_v62 = vpop.eup %1355 }
 0x185   : > { %v1186_v58 = vadd.f32 -1.4531521, %v763_v53  ;;  %v764_v5 = vmul.f32 1.0614054, %v1356_v62  ;;  %v1358_v38 = vpop.eup %1357 }
 0x186   : > { %v769_v59 = vmul.f32 %v1350_v48, %v1184_v56  ;;  %v1185_v4 = vadd.f32 -1.4531521, %v762_v60  ;;  %v1360_v40 = vpop.eup %1359  ;;  %v419_v56 = vsub.s32 1, %v1742_v6 }
 0x187   : > { %v771_v63 = vmul.f32 %v1352_v49, %v1186_v58  ;;  %v1187_v0 = vadd.f32 -1.4531521, %v764_v5  ;;  %v1362_v50 = vpop.eup %1361 }
 0x188   : > { %v773_v3 = vadd.f32 1.4214138, %v769_v59  ;;  %v770_v12 = vmul.f32 %v1354_v57, %v1185_v4  ;;  %v1364_v55 = vpop.eup %1363  ;;  %v420_v5 = vrot.slane %v1750_v11, %v419_v56 }
 0x189   : > { %v775_v7 = vadd.f32 1.4214138, %v771_v63  ;;  %v772_v17 = vmul.f32 %v1356_v62, %v1187_v0  ;;  %v423_v63 = vsub.s32 2, %v1742_v6  ;;  %v738_v0 = vmul.f32 0.5, %v1772_v26 }
 0x18a   : > { %v777_v8 = vmul.f32 %v1350_v48, %v773_v3  ;;  %v774_v16 = vadd.f32 1.4214138, %v770_v12  ;;  %v522_v30 = vadd.f32 %v1756_v14, %v420_v5 }
 0x18b   : > { %v779_v13 = vmul.f32 %v1352_v49, %v775_v7  ;;  %v776_v23 = vadd.f32 1.4214138, %v772_v17 }
 0x18c   : > { %v1188_v2 = vadd.f32 -0.28449672, %v777_v8  ;;  %v778_v22 = vmul.f32 %v1354_v57, %v774_v16  ;;  %v739_v16 = vmul.f32 0.5, %v1764_v21 }
 0x18d   : > { %v1190_v18 = vadd.f32 -0.28449672, %v779_v13  ;;  %v780_v33 = vmul.f32 %v1356_v62, %v776_v23 }
 0x18e   : > { %v785_v19 = vmul.f32 %v1350_v48, %v1188_v2  ;;  %v1189_v32 = vadd.f32 -0.28449672, %v778_v22 }
 0x18f   : > { %v787_v28 = vmul.f32 %v1352_v49, %v1190_v18  ;;  %v1191_v37 = vadd.f32 -0.28449672, %v780_v33 }
 0x190   : > { %v789_v29 = vadd.f32 0.2548296, %v785_v19  ;;  %v786_v36 = vmul.f32 %v1354_v57, %v1189_v32 }
 0x191   : > { %v791_v34 = vadd.f32 0.2548296, %v787_v28  ;;  %v788_v43 = vmul.f32 %v1356_v62, %v1191_v37 }
 0x192   : > { %v793_v35 = vmul.f32 %v1350_v48, %v789_v29  ;;  %v790_v42 = vadd.f32 0.2548296, %v786_v36  ;;  %v415_v48 = vsub.s32 0, %v1742_v6 }
 0x193   : > { %v795_v39 = vmul.f32 %v1352_v49, %v791_v34  ;;  %v792_v47 = vadd.f32 0.2548296, %v788_v43 }
 0x194   : > { %v813_v41 = vmul.f32 %v1358_v38, %v793_v35  ;;  %v794_v46 = vmul.f32 %v1354_v57, %v790_v42  ;;  %v427_v57 = vsub.s32 3, %v1742_v6  ;;  %v416_v4 = vrot.slane %v1750_v11, %v415_v48 }
 0x195   : > { %v815_v44 = vmul.f32 %v1360_v40, %v795_v39  ;;  %v796_v54 = vmul.f32 %v1356_v62, %v792_v47  ;;  %v424_v6 = vrot.slane %v1750_v11, %v423_v63 }
 0x196   : > { %v817_v45 = vsub.f32 1.0, %v813_v41  ;;  %v814_v53 = vmul.f32 %v1362_v50, %v794_v46  ;;  %v428_v12 = vrot.slane %v1750_v11, %v427_v57  ;;  %v520_v22 = vadd.f32 %v1746_v9, %v416_v4  ;;  %v1192_v9 = vld [vmem:[%s1850_s4] ss:$0 sm:$0xff] }
 0x197   : > { %v819_v51 = vsub.f32 1.0, %v815_v44  ;;  %v816_v60 = vmul.f32 %v1364_v55, %v796_v54  ;;  %v591_v11 = vadd.f32 %v1748_v10, %v424_v6 }
 0x198   : > { %v825_v52 = vsub.f32 0.0, %v817_v45  ;;  %v818_v59 = vsub.f32 1.0, %v814_v53  ;;  %v593_v26 = vadd.f32 %v1758_v15, %v428_v12 }
 0x199   : > { %v827_v49 = vsub.f32 0.0, %v819_v51  ;;  %v820_v3 = vsub.f32 1.0, %v816_v60 }
 0x19a   : > { %v829_v58 = vsel %vm821_vm0, %v817_v45, %v825_v52  ;;  %v826_v62 = vsub.f32 0.0, %v818_v59 }
 0x19b   : > { %v831_v61 = vsel %vm823_vm1, %v819_v51, %v827_v49  ;;  %v833_v1 = vadd.f32 1.0, %v829_v58  ;;  %v828_v8 = vsub.f32 0.0, %v820_v3 }
 0x19c   : > { %v835_v7 = vadd.f32 1.0, %v831_v61  ;;  %v830_v25 = vsel %vm822_vm2, %v818_v59, %v826_v62 }
 0x19d   : > { %v834_v13 = vadd.f32 1.0, %v830_v25  ;;  %v837_v2 = vmul.f32 %v833_v1, %v737_v24  ;;  %v832_v17 = vsel %vm824_vm3, %v820_v3, %v828_v8 }
 0x19e   : > { %v836_v19 = vadd.f32 1.0, %v832_v17  ;;  %v839_v23 = vmul.f32 %v835_v7, %v739_v16 }
 0x19f   : > { %v838_v18 = vmul.f32 %v834_v13, %v738_v0  ;;  %v841_v29 = vmul.f32 %v837_v2, %v520_v22 }
 0x1a0   : > { %v840_v28 = vmul.f32 %v836_v19, %v740_v20  ;;  %v843_v32 = vmul.f32 %v839_v23, %v591_v11 }
 0x1a1   : > { %v842_v31 = vmul.f32 %v838_v18, %v522_v30 }
 0x1a2   : > { %v844_v21 = vmul.f32 %v840_v28, %v593_v26 }
 0x1a3   : > { %980 = vmatprep.mubr.f32.mxu0 %v842_v31 }
 0x1a4   : > { %981 = vmatmul.mubr.f32.vlgmr.msra.gmra.mxu0 %v841_v29  ;;  %1050 = vmatprep.mubr.f32.mxu1 %v844_v21 }
 0x1a5   : > { %1051 = vmatmul.mubr.f32.vlgmr.msra.gmra.mxu1 %v843_v32 }
 0x264   : > { %v1229_v14 = vpop.f32.mrf.mxu0 }
 0x265   : > { %v1264_v27 = vpop.f32.mrf.mxu1 }
 0x266   : > { %v1230_v15 = vpop.f32.mrf.mxu0 }
 0x267   : > { %v1231_v33 = vadd.f32 %v1230_v15, %v1229_v14  ;;  %v1265_v34 = vpop.f32.mrf.mxu1 }
 0x268   : > { %v1266_v35 = vadd.f32 %v1265_v34, %v1264_v27 }
 0x269   : > { %v983_v10 = vadd.f32 %v1231_v33, %v1192_v9 }
 0x26b   : > { %v1053_v36 = vadd.f32 %v1266_v35, %v983_v10 }
 0x26d   : > { %1056 = vst [vmem:[%s281_s17] sm:$0xff] %v1053_v36 }
 0x26e   : > { %1484 = shalt.err (!%p1481_p9)
}
 0x26f   : > { %s1485_s30 = scalar_lea.hbm %s1069_s8, 128  ;;  %s1489_s9 = scalar_lea.hbm %s1851_s5, 256 }
 0x270   : > { %p1486_p13 = scmp.ne.s32.totalorder %s1069_s8, %s1485_s30  ;;  %p1490_p11 = scmp.lt.s32.totalorder %s1069_s8, %s1851_s5 }
 0x271   : > { %p1491_p1 = scmp.lt.s32.totalorder %s1489_s9, %s1485_s30 }
 0x272   : > { %p1487_p8 = pnand %p1486_p13, %p1869_p6 }
 0x273   : > { %p1492_p2 = por %p1491_p1, %p1490_p11 }
 0x274   : > { %p1488_p10 = pneg %p1487_p8 }
 0x276   : > { %p1493_p4 = pnand %p1492_p2, %p1488_p10 }
 0x278   : > { %1496 = shalt.err (!%p1493_p4)
}
 0x279   : > { %1281 = dma.vmem_to_hbm [thread:$0]  (%p1869_p6), %s1072_s23, 128, %s1069_s8, %s1058_s13  }
 0x27a PF: > { %s1083_s15 = sand.u32 1, %s1531_s18   ;;  %p1870_p12 = scmp.ne.s32.totalorder %s1857_s25, 0 }
 0x27b   : > { %p1871_p0 = scmp.ge.s32.totalorder %s1543_s21, 2  ;;  %s1084_s17 = scalar_lea.sflag [#allocation4], %s1083_s15 }
 0x27d   : > { %p1298_p5 = pnand %p1871_p0, %p1870_p12 }
 0x27f   : > { %p1299_p3 = pneg %p1298_p5 }
 0x281   : > { %1526 = dma.done.wait (%p1299_p3), %s1084_s17, 128  }
 0x282   : > { %1528 = vsyncadd (%p1299_p3), %s1084_s17, 4294967168  ;;  %p20_p7 = scmp.ge.s32.totalorder %s1665_s6, 4   ;;  %s1872_s18 = smov %s1535_s19 }
 0x283   : > { %s1873_s19 = smov %s1539_s20  ;;  %s1874_s20 = smov %s1675_s10 }
 0x284   : > { %s1875_s21 = smov %s1665_s6  ;;  %22 = sbr.rel (!%p20_p7) target bundleno = 7 (0x7), region = 97 }
 0x289   :  { %1089 = vsyncpa [#allocation3], 1 }
 0x28a   :  { %1091 = vsyncpa [#allocation3 + $0x1], 1 }
 0x28b   :  { %1092 = vsyncpa [#allocation6], 1 }
 0x28c   :  { %1093 = vsyncpa [#allocation9], 1 }
 0x28d   :  { %1094 = vsyncpa [#allocation4], 1 }
 0x28e   :  { %1096 = vsyncpa [#allocation4 + $0x1], 1 }

</bundles_post_ra>
